<compile_context>
chip_gen: v6e
topology: v6e:2x2x1
jax: 0.10.0
libtpu: 0.0.40
codegen_flags: <defaults>
</compile_context>

<pallas_src>
import functools
import math

import jax
import jax.numpy as jnp
from jax import lax
from jax.experimental import pallas as pl
from jax.experimental.pallas import tpu as pltpu

LN_EPS = 1e-5  # torch.nn.LayerNorm default


def _round_up(x, m):
    return ((x + m - 1) // m) * m


def _cdiv(a, b):
    return -(-a // b)


def _vmem_limits():
    """Per-generation VMEM limit (for the compiler) and tile-sizing budget."""
    cap = None
    try:
        info = pltpu.get_tpu_info()
        cap = int(getattr(info, "vmem_capacity_bytes", 0))
    except Exception:
        cap = None
    if not cap or cap <= 0:
        cap = 64 * 1024 * 1024            # conservative (v7x-sized) fallback
    limit = (cap * 3) // 4                # 48 MiB on v7x, 96 MiB on v5e/v6e
    budget = (limit * 3) // 4             # ~25% headroom for compiler scratch
    return budget, limit


def _pick_tile_rows(rows, D, Dout, x_it, w_it, out_it, budget):
    """Row tile for the single-pass path, or None if W does not fit VMEM."""
    # W + bias resident once (single-buffered via memory_space=VMEM).
    fixed = D * Dout * w_it + Dout * 4
    # Per tile row: double-buffered x block + double-buffered out block
    # + f32 temporaries (x_f32/xc, y in the weight dtype, f32 accumulator)
    # + slack for (tm,1) stat columns (padded to 128 lanes in VMEM).
    per_row = (2 * D * x_it + 2 * Dout * out_it
               + 4 * (2 * D + Dout) + D * w_it + 1024)
    avail = budget - fixed
    if avail < min(rows, 8) * per_row:
        return None                        # weight too large -> K-split path
    if rows <= 8:
        return rows                        # single tile == full array dim
    t = min(avail // per_row, 1024)
    for align in (256, 128, 8):            # 256 fills v6e/v7x MXU, 128 v5e
        if t >= align:
            t = (t // align) * align
            break
    # Keep >= 2 grid steps so v7x's second TensorCore is never idle.
    t = min(t, _round_up((rows + 1) // 2, 8))
    return max(int(t), 8)


def _pick_ksplit_tiles(rows, D, Dout, x_it, w_it, out_it, budget, tk=None):
    """Tiles for the K-split path (weight streamed along the reduction dim)."""
    if tk is None:
        budget_w = budget // 3             # <= 1/3 of budget for W blocks
        for cand in range(128, D + 1, 128):
            if D % cand == 0 and 2 * cand * Dout * w_it <= budget_w:
                tk = cand                  # keep the largest fitting one
        if tk is None and 2 * D * Dout * w_it <= budget_w:
            tk = D
        if tk is None:
            raise ValueError(
                "prenorm_linear: no K tile (multiple of 128 dividing "
                f"dim={D}) fits the VMEM budget ({budget} bytes) for "
                f"dim_out={Dout}; use a narrower mxu_dtype or smaller dim_out.")
    fixed = 2 * tk * Dout * w_it + 2 * Dout * 4      # W blocks + bias + wsum
    per_row = (2 * tk * x_it               # double-buffered x block
               + Dout * 4                  # f32 accumulator scratch
               + 2 * Dout * out_it         # double-buffered out block
               + 4 * (tk + Dout)           # f32 temporaries
               + 1024)                     # (tm,1) stat columns (lane-padded)
    avail = budget - fixed
    if avail < min(rows, 8) * per_row:
        raise ValueError(
            "prenorm_linear: even an 8-row tile does not fit the VMEM budget "
            f"({budget} bytes) with k_tile={tk}, dim_out={Dout}.")
    if rows <= 8:
        return rows, tk
    tm = min(avail // per_row, 1024)
    for align in (256, 128, 8):
        if tm >= align:
            tm = (tm // align) * align
            break
    tm = min(tm, _round_up((rows + 1) // 2, 8))
    return max(int(tm), 8), tk


# ----------------------------------------------------------------------------
# Kernels
# ----------------------------------------------------------------------------

def _prenorm_linear_kernel(x_ref, w_ref, b_ref, o_ref):
    """One row tile: LayerNorm over the last dim, then the fused Linear.

    x_ref: (tm, D) block.  w_ref: full (D, Dout) folded weight resident in
    VMEM.  b_ref: full (1, Dout) folded bias (f32).  o_ref: (tm, Dout) block.
    """
    x = x_ref[...].astype(jnp.float32)                       # (tm, D)
    mean = jnp.mean(x, axis=-1, keepdims=True)                # (tm, 1)
    xc = x - mean
    var = jnp.mean(xc * xc, axis=-1, keepdims=True)           # biased (torch)
    rstd = lax.rsqrt(var + LN_EPS)
    y = (xc * rstd).astype(w_ref.dtype)                       # (tm, D)
    acc = jnp.dot(y, w_ref[...], preferred_element_type=jnp.float32)
    o_ref[...] = (acc + b_ref[...]).astype(o_ref.dtype)


def _prenorm_linear_ksplit_kernel(x_ref, w_ref, b_ref, o_ref,
                                  acc_ref, s1_ref, s2_ref, wsum_ref, *, d):
    """K-split path: stream W along the reduction dim with an f32 accumulator.

    Uses  (x-mean)*rstd @ W' = rstd*(x @ W') - rstd*mean*colsum(W'),
    so a single pass over K suffices (partial sums for mean / E[x^2]).
    """
    k = pl.program_id(1)
    nk = pl.num_programs(1)

    @pl.when(k == 0)
    def _init():
        acc_ref[...] = jnp.zeros_like(acc_ref)
        s1_ref[...] = jnp.zeros_like(s1_ref)
        s2_ref[...] = jnp.zeros_like(s2_ref)
        wsum_ref[...] = jnp.zeros_like(wsum_ref)

    xk = x_ref[...].astype(jnp.float32)                       # (tm, tk)
    s1_ref[...] += jnp.sum(xk, axis=-1, keepdims=True)
    s2_ref[...] += jnp.sum(xk * xk, axis=-1, keepdims=True)

    wk = w_ref[...]                                           # (tk, Dout)
    # Column sums of the folded weight, recomputed per row tile from the
    # block already in VMEM (safe under megacore sharding of the row axis).
    wsum_ref[...] += jnp.sum(wk.astype(jnp.float32), axis=0, keepdims=True)
    acc_ref[...] += jnp.dot(x_ref[...].astype(wk.dtype), wk,
                            preferred_element_type=jnp.float32)

    @pl.when(k == nk - 1)
    def _finalize():
        inv_d = jnp.float32(1.0 / d)
        mean = s1_ref[...] * inv_d                            # (tm, 1)
        var = s2_ref[...] * inv_d - mean * mean
        rstd = lax.rsqrt(var + LN_EPS)
        out = rstd * acc_ref[...] - (rstd * mean) * wsum_ref[...] + b_ref[...]
        o_ref[...] = out.astype(o_ref.dtype)


# ----------------------------------------------------------------------------
# Wrapper
# ----------------------------------------------------------------------------

def prenorm_linear(x, gamma, beta, w, wb, *, tile_rows=None, k_tile=None,
                   mxu_dtype=None, vmem_budget_bytes=None,
                   vmem_limit_bytes=None):
    """PreNorm(dim, fn=Linear(dim, dim_out)) applied to x of shape (..., dim)."""
    *lead, D = x.shape
    Dout = w.shape[1]
    rows = math.prod(lead) if lead else 1
    f32 = jnp.float32

    # --- one-time parameter fold (exact algebra, not a per-call prescale) ---
    #   (y*gamma + beta) @ W + wb  ==  y @ (gamma[:,None]*W) + (beta @ W + wb)
    gamma_f = gamma.astype(f32)
    beta_f = beta.astype(f32)
    w_f = w.astype(f32)
    compute_dtype = jnp.dtype(mxu_dtype) if mxu_dtype is not None else w.dtype
    w_folded = (gamma_f[:, None] * w_f).astype(compute_dtype)        # (D, Dout)
    b_folded = (beta_f @ w_f + wb.astype(f32)).reshape(1, Dout)       # f32

    budget, limit = _vmem_limits()
    if vmem_budget_bytes is not None:
        budget = int(vmem_budget_bytes)
    if vmem_limit_bytes is not None:
        limit = int(vmem_limit_bytes)

    x2 = x.reshape(rows, D)                                # metadata-only reshape
    x_it = x2.dtype.itemsize
    w_it = w_folded.dtype.itemsize
    out_it = x.dtype.itemsize

    use_ksplit = k_tile is not None
    if not use_ksplit and tile_rows is None:
        tile_rows = _pick_tile_rows(rows, D, Dout, x_it, w_it, out_it, budget)
        if tile_rows is None:
            use_ksplit = True              # W does not fit resident in VMEM

    if use_ksplit:
        if k_tile is not None:
            if D % k_tile != 0 or not (k_tile % 128 == 0 or k_tile == D):
                raise ValueError(
                    "k_tile must divide dim and be a multiple of 128 "
                    "(or equal dim)")
        tm_auto, tk = _pick_ksplit_tiles(rows, D, Dout, x_it, w_it, out_it,
                                         budget, tk=k_tile)
        tm = tile_rows if tile_rows is not None else tm_auto
        grid = (_cdiv(rows, tm), D // tk)
        out2 = pl.pallas_call(
            functools.partial(_prenorm_linear_ksplit_kernel, d=D),
            out_shape=jax.ShapeDtypeStruct((rows, Dout), x.dtype),
            grid_spec=pltpu.PrefetchScalarGridSpec(
                num_scalar_prefetch=0,
                grid=grid,
                in_specs=[
                    pl.BlockSpec((tm, tk), lambda i, k: (i, k)),     # x chunk
                    pl.BlockSpec((tk, Dout), lambda i, k: (k, 0)),   # W chunk
                    pl.BlockSpec(memory_space=pltpu.MemorySpace.VMEM),  # bias
                ],
                out_specs=pl.BlockSpec((tm, Dout), lambda i, k: (i, 0)),
                scratch_shapes=[
                    pltpu.VMEM((tm, Dout), jnp.float32),   # f32 accumulator
                    pltpu.VMEM((tm, 1), jnp.float32),      # sum(x)
                    pltpu.VMEM((tm, 1), jnp.float32),      # sum(x^2)
                    pltpu.VMEM((1, Dout), jnp.float32),    # colsum(W')
                ],
            ),
            compiler_params=pltpu.CompilerParams(
                dimension_semantics=("parallel", "arbitrary"),
                vmem_limit_bytes=limit,
            ),
        )(x2, w_folded, b_folded)
    else:
        grid = (_cdiv(rows, tile_rows),)   # ragged last block is fine: the
        # LayerNorm+matmul is row-wise, garbage OOB rows never touch valid
        # rows and their writes are masked on writeback.
        out2 = pl.pallas_call(
            _prenorm_linear_kernel,
            out_shape=jax.ShapeDtypeStruct((rows, Dout), x.dtype),
            grid_spec=pltpu.PrefetchScalarGridSpec(
                num_scalar_prefetch=0,
                grid=grid,
                in_specs=[
                    pl.BlockSpec((tile_rows, D), lambda i: (i, 0)),  # x rows
                    pl.BlockSpec(memory_space=pltpu.MemorySpace.VMEM),  # W
                    pl.BlockSpec(memory_space=pltpu.MemorySpace.VMEM),  # bias
                ],
                out_specs=pl.BlockSpec((tile_rows, Dout), lambda i: (i, 0)),
            ),
            compiler_params=pltpu.CompilerParams(
                dimension_semantics=("parallel",),
                vmem_limit_bytes=limit,
            ),
        )(x2, w_folded, b_folded)

    return out2.reshape(*lead, Dout)


def prenorm_linear_ref(x, gamma, beta, w, wb):
    """Pure-JAX reference matching torch: fn(LayerNorm(x)), fn = Linear."""
    xf = x.astype(jnp.float32)
    mean = jnp.mean(xf, axis=-1, keepdims=True)
    var = jnp.mean((xf - mean) ** 2, axis=-1, keepdims=True)
    y = (xf - mean) * lax.rsqrt(var + LN_EPS) * gamma.astype(jnp.float32) \
        + beta.astype(jnp.float32)
    out = y @ w.astype(jnp.float32) + wb.astype(jnp.float32)
    return out.astype(x.dtype)


if __name__ == "__main__":
    key = jax.random.PRNGKey(0)
    (kx, kg, kb, kw, kwb, kx2,
     kx3, kg3, kb3, kw3, kwb3) = jax.random.split(key, 11)

    # Small ViT-style shapes: batch=2, seq=8, dim=32.
    B, N, D = 2, 8, 32
    x = jax.random.normal(kx, (B, N, D), dtype=jnp.float32)
    gamma = 1.0 + 0.05 * jax.random.normal(kg, (D,), dtype=jnp.float32)
    beta = 0.05 * jax.random.normal(kb, (D,), dtype=jnp.float32)
    w = 0.1 * jax.random.normal(kw, (D, D), dtype=jnp.float32)
    wb = 0.1 * jax.random.normal(kwb, (D,), dtype=jnp.float32)
    ref = prenorm_linear_ref(x, gamma, beta, w, wb)

    # 1) Default single-pass path (W resident in VMEM, >=2 grid steps).
    out = jax.block_until_ready(prenorm_linear(x, gamma, beta, w, wb))
    assert out.shape == (B, N, D)
    assert jnp.allclose(out, ref, atol=1e-4, rtol=1e-4), "mismatch (default)"

    # 2) Row count not divisible by the tile -> ragged last block (no jnp.pad).
    x_odd = jax.random.normal(kx2, (2, 9, D), dtype=jnp.float32)
    out_odd = jax.block_until_ready(prenorm_linear(x_odd, gamma, beta, w, wb))
    ref_odd = prenorm_linear_ref(x_odd, gamma, beta, w, wb)
    assert out_odd.shape == (2, 9, D)
    assert jnp.allclose(out_odd, ref_odd, atol=1e-4, rtol=1e-4), \
        "mismatch (ragged rows)"

    # 3) Forced K-split path (auto-selected when W exceeds the VMEM budget).
    D3 = 256
    x3 = jax.random.normal(kx3, (2, 8, D3), dtype=jnp.float32)
    gamma3 = 1.0 + 0.05 * jax.random.normal(kg3, (D3,), dtype=jnp.float32)
    beta3 = 0.05 * jax.random.normal(kb3, (D3,), dtype=jnp.float32)
    w3 = 0.1 * jax.random.normal(kw3, (D3, D3), dtype=jnp.float32)
    wb3 = 0.1 * jax.random.normal(kwb3, (D3,), dtype=jnp.float32)
    out_ks = jax.block_until_ready(
        prenorm_linear(x3, gamma3, beta3, w3, wb3, tile_rows=8, k_tile=128))
    ref_ks = prenorm_linear_ref(x3, gamma3, beta3, w3, wb3)
    assert out_ks.shape == (2, 8, D3)
    assert jnp.allclose(out_ks, ref_ks, atol=2e-3, rtol=2e-3), \
        "mismatch (K-split)"

    # 4) Optional bf16 MXU mode (f32 accumulation; looser tolerance).
    out_bf = jax.block_until_ready(
        prenorm_linear(x, gamma, beta, w, wb, mxu_dtype=jnp.bfloat16))
    assert jnp.allclose(out_bf, ref, atol=5e-2, rtol=5e-2), "mismatch (bf16 MXU)"

    print("KERNEL_OK")
</pallas_src>

<mosaic_0001>
module attributes {stable_mosaic.version = 11 : i64} {
  func.func @_prenorm_linear_kernel(%arg0: i32, %arg1: memref<8x32xf32, #tpu.memory_space<vmem>>, %arg2: memref<32x32xf32, #tpu.memory_space<vmem>>, %arg3: memref<1x32xf32, #tpu.memory_space<vmem>>, %arg4: memref<8x32xf32, #tpu.memory_space<vmem>>) attributes {dimension_semantics = [#tpu.dimension_semantics<parallel>], iteration_bounds = array<i64: 2>, scalar_prefetch = 0 : i64, scratch_operands = 0 : i64, tpu.core_type = #tpu.core_type<tc>, window_params = [{transform_indices = @transform_0, window_bounds = array<i64: 8, 32>}, {pipeline_mode = #tpu.pipeline_mode<synchronous>, transform_indices = @transform_1, window_bounds = array<i64: 32, 32>}, {pipeline_mode = #tpu.pipeline_mode<synchronous>, transform_indices = @transform_2, window_bounds = array<i64: 1, 32>}, {transform_indices = @transform_3, window_bounds = array<i64: 8, 32>}]} {
    %c0 = arith.constant 0 : index
    %c0_0 = arith.constant 0 : index
    %0 = vector.load %arg1[%c0, %c0_0] : memref<8x32xf32, #tpu.memory_space<vmem>>, vector<8x32xf32>
    %cst = arith.constant dense<0.000000e+00> : vector<8xf32>
    %1 = vector.multi_reduction <add>, %0, %cst [1] : vector<8x32xf32> to vector<8xf32>
    %2 = vector.shape_cast %1 : vector<8xf32> to vector<8x1xf32>
    %cst_1 = arith.constant 3.200000e+01 : f32
    %3 = vector.broadcast %cst_1 : f32 to vector<8x1xf32>
    %4 = arith.divf %2, %3 : vector<8x1xf32>
    %5 = vector.broadcast %4 : vector<8x1xf32> to vector<8x32xf32>
    %6 = arith.subf %0, %5 : vector<8x32xf32>
    %7 = arith.mulf %6, %6 : vector<8x32xf32>
    %cst_2 = arith.constant dense<0.000000e+00> : vector<8xf32>
    %8 = vector.multi_reduction <add>, %7, %cst_2 [1] : vector<8x32xf32> to vector<8xf32>
    %9 = vector.shape_cast %8 : vector<8xf32> to vector<8x1xf32>
    %cst_3 = arith.constant 3.200000e+01 : f32
    %10 = vector.broadcast %cst_3 : f32 to vector<8x1xf32>
    %11 = arith.divf %9, %10 : vector<8x1xf32>
    %cst_4 = arith.constant 9.99999974E-6 : f32
    %12 = vector.broadcast %cst_4 : f32 to vector<8x1xf32>
    %13 = arith.addf %11, %12 : vector<8x1xf32>
    %14 = math.rsqrt %13 : vector<8x1xf32>
    %15 = vector.broadcast %14 : vector<8x1xf32> to vector<8x32xf32>
    %16 = arith.mulf %6, %15 : vector<8x32xf32>
    %c0_5 = arith.constant 0 : index
    %c0_6 = arith.constant 0 : index
    %17 = vector.load %arg2[%c0_5, %c0_6] : memref<32x32xf32, #tpu.memory_space<vmem>>, vector<32x32xf32>
    %cst_7 = arith.constant dense<0.000000e+00> : vector<8x32xf32>
    %18 = tpu.matmul %16, %17, %cst_7 {dimension_numbers = #tpu.dot_dimension_numbers<[1], [0], [0], [1], [0, 0, 1, 1], [], []>} : vector<8x32xf32>, vector<32x32xf32>, vector<8x32xf32> -> vector<8x32xf32>
    %c0_8 = arith.constant 0 : index
    %c0_9 = arith.constant 0 : index
    %19 = vector.load %arg3[%c0_8, %c0_9] : memref<1x32xf32, #tpu.memory_space<vmem>>, vector<1x32xf32>
    %20 = vector.broadcast %19 : vector<1x32xf32> to vector<8x32xf32>
    %21 = arith.addf %18, %20 : vector<8x32xf32>
    %c0_10 = arith.constant 0 : index
    %c0_11 = arith.constant 0 : index
    %22 = vector.load %arg4[%c0_10, %c0_11] : memref<8x32xf32, #tpu.memory_space<vmem>>, vector<8x32xf32>
    tpu.vector_store %arg4[%c0_10, %c0_11], %21 {strides = array<i32>} : memref<8x32xf32, #tpu.memory_space<vmem>>, vector<8x32xf32>,
    return
  }
  func.func @transform_0(%arg0: i32) -> (i32, i32) {
    %c0_i32 = arith.constant 0 : i32
    %c0_i32_0 = arith.constant 0 : i32
    return %arg0, %c0_i32 : i32, i32
  }
  func.func @transform_1(%arg0: i32) -> (i32, i32) {
    %c0_i32 = arith.constant 0 : i32
    %c0_i32_0 = arith.constant 0 : i32
    %c0_i32_1 = arith.constant 0 : i32
    return %c0_i32, %c0_i32_0 : i32, i32
  }
  func.func @transform_2(%arg0: i32) -> (i32, i32) {
    %c0_i32 = arith.constant 0 : i32
    %c0_i32_0 = arith.constant 0 : i32
    %c0_i32_1 = arith.constant 0 : i32
    return %c0_i32, %c0_i32_0 : i32, i32
  }
  func.func @transform_3(%arg0: i32) -> (i32, i32) {
    %c0_i32 = arith.constant 0 : i32
    %c0_i32_0 = arith.constant 0 : i32
    return %arg0, %c0_i32 : i32, i32
  }
}

</mosaic_0001>

<bundles_post_ra>
// kernel: tpu_custom_call.1
= control target key start
LH: loop header
LB: loop body
LE: loop exit
PB: predicated region body
PF: predicated region fallthrough
CT: control target
= control target key end

     0   :  { %8 = vsyncpa [#allocation3], 0  ;;  %s813_s0 = inlined_call_operand.hbm [shape: f32[16,32], index: 0, kind: input, shape index: {}]   ;;  %s814_s1 = inlined_call_operand.hbm [shape: f32[32,32], index: 1, kind: input, shape index: {}]   ;;  %s815_s2 = inlined_call_operand.vmem [shape: f32[1,32], index: 2, kind: input, shape index: {}]   ;;  %s816_s3 = inlined_call_operand.hbm [shape: f32[16,32], index: 3, kind: output, shape index: {}]  }
   0x1   :  { %10 = vsyncpa [#allocation3 + $0x1], 0 }
   0x2   :  { %11 = vsyncpa [#allocation6], 0 }
   0x3   :  { %12 = vsyncpa [#allocation4], 0 }
   0x4   :  { %14 = vsyncpa [#allocation4 + $0x1], 0  ;;  %s642_s12 = smov 0   ;;  %s644_s13 = smov 0  }
   0x5   :  { %s646_s14 = smov 0   ;;  %s648_s15 = smov 0  }
   0x6 LB: > { %s663_s16 = sadd.s32 4294967295, %s613_s15   ;;  %s396_s17 = sadd.s32 4294967294, %s613_s15   ;;  %s613_s15 = sphi %s648_s15, %s838_s15   ;;  %s609_s14 = sphi %s646_s14, %s837_s14   ;;  %s605_s13 = sphi %s644_s13, %s836_s13   ;;  %s601_s12 = sphi %s642_s12, %s835_s12  }
   0x7   : > { %p40_p0 = scmp.ne.s32.totalorder %s605_s13, %s601_s12  ;;  %p817_p1 = scmp.eq.s32.totalorder %s663_s16, 0 }
   0x8   : > { %p112_p3 = scmp.eq.s32.totalorder %s396_s17, 1  ;;  %p397_p5 = scmp.ge.s32.totalorder %s613_s15, 1 }
   0x9   : > { %p672_p4 = por %p817_p1, %p40_p0  ;;  %p119_p7 = scmp.lt.s32.totalorder %s613_s15, 3 }
   0xa   : > { %p677_p6 = por %p112_p3, %p40_p0  ;;  %s615_s21 = smov [#allocation5]  }
   0xb   : > { %s821_s18 = scalar_select %p672_p4, 1, 0 }
   0xc   : > { %s822_s19 = scalar_select %p677_p6, 1, 0 }
   0xd   : > { %p682_p8 = pnand %p397_p5, %p119_p7  ;;  %s131_s22 = sshll.u32 %s615_s21, 4  ;;  %s132_s22 = int_to_ptr.vmem [resolvable:$true] %s131_s22 }
   0xe   : > { %s696_s24 = sadd.s32 1, %s613_s15   ;;  %s27_s25 = sadd.s32 1, %s609_s14 }
   0xf   : > { %s823_s20 = scalar_select %p682_p8, 1, 0 }
  0x10   : > { %p436_p9 = pneg %p682_p8  ;;  %s24_s26 = ssub.s32 %s613_s15, %s696_s24 }
  0x11   : > { %s502_s27 = scalar_lea.vmem %s132_s22, 512  ;;  %p510_p5 = scmp.lt.s32.totalorder %s132_s22, %s132_s22 }
  0x12   : > { %p691_p11 = pnand %p436_p9, %p817_p1  ;;  %p503_p13 = scmp.ne.s32.totalorder %s132_s22, %s502_s27 }
  0x13   : > { %p511_p7 = scmp.lt.s32.totalorder %s502_s27, %s502_s27 }
  0x14   : > { %p493_p12 = pneg %p691_p11 }
  0x15   : > { %p512_p10 = por %p511_p7, %p510_p5 }
  0x16   : > { %p505_p0 = pnand %p503_p13, %p493_p12 }
  0x18   : > { %p506_p3 = pneg %p505_p0 }
  0x1a   : > { %p513_p2 = pnand %p512_p10, %p506_p3 }
  0x1c   : > { %516 = shalt.err (!%p513_p2)
}
  0x1d   : > { %s616_s28 = smov 128   ;;  %s617_s29 = smov 8  }
  0x1e   : > { %439 = dma.hbm_to_vmem [thread:$0]  (!%p691_p11), %s814_s1, 512, %s132_s22, [#allocation6], %s616_s28, %s616_s28, %s617_s29  }
  0x1f   : > { %p25_p9 = scmp.eq.s32.totalorder %s24_s26, 0  ;;  %p34_p12 = scmp.ne.s32.totalorder %s609_s14, %s605_s13 }
  0x20   : > { %p35_p10 = scmp.eq.s32.totalorder %s613_s15, 0  ;;  %p449_p2 = scmp.lt.s32.totalorder %s613_s15, 2 }
  0x21   : > { %s713_s5 = scalar_select %p25_p9, %s609_s14, %s27_s25  }
  0x22   : > { %p36_p13 = por %p35_p10, %p34_p12  ;;  %p825_p0 = scmp.eq.s32.totalorder %s663_s16, 1 }
  0x23   : > { %s148_s7 = sand.u32 1, %s609_s14   ;;  %s401_s8 = sshll.u32 %s613_s15, 7 }
  0x24   : > { %p717_p3 = por %p825_p0, %p34_p12  ;;  %s400_s9 = sshll.u32 %s148_s7, 3 }
  0x25   : > { %s726_s17 = scalar_lea.hbm %s813_s0, %s401_s8  ;;  %s152_s21 = scalar_lea.vmem [#allocation2], %s400_s9 }
  0x26   : > { %s826_s6 = scalar_select %p717_p3, 1, 0 }
  0x27   : > { %s159_s22 = sshll.u32 %s152_s21, 4  ;;  %p728_p11 = pnand %p449_p2, %p36_p13  ;;  %s160_s22 = int_to_ptr.vmem [resolvable:$true] %s159_s22 }
  0x28   : > { %s149_s25 = scalar_lea.sflag [#allocation3], %s148_s7  ;;  %s517_s26 = scalar_lea.hbm %s726_s17, 128 }
  0x29   : > { %p518_p5 = scmp.ne.s32.totalorder %s726_s17, %s517_s26  ;;  %p519_p7 = pneg %p728_p11 }
  0x2a   : > { %s522_s29 = scalar_lea.hbm %s813_s0, 256  ;;  %p523_p10 = scmp.lt.s32.totalorder %s726_s17, %s813_s0 }
  0x2b   : > { %p520_p9 = pnand %p519_p7, %p518_p5  ;;  %p524_p2 = scmp.lt.s32.totalorder %s522_s29, %s517_s26 }
  0x2d   : > { %p521_p12 = pneg %p520_p9  ;;  %p525_p13 = por %p524_p2, %p523_p10 }
  0x2f   : > { %p526_p0 = pnand %p525_p13, %p521_p12 }
  0x31   : > { %529 = shalt.err (!%p526_p0)
}
  0x32   : > { %s530_s8 = scalar_lea.vmem %s160_s22, 128  ;;  %s618_s7 = smov [#allocation2]  }
  0x33   : > { %p531_p1 = scmp.ne.s32.totalorder %s160_s22, %s530_s8  ;;  %s535_s9 = sshll.u32 %s618_s7, 4  ;;  %s536_s9 = int_to_ptr.vmem [resolvable:$false] %s535_s9 }
  0x34   : > { %s537_s10 = scalar_lea.vmem %s536_s9, 256  ;;  %p538_p5 = scmp.lt.s32.totalorder %s160_s22, %s536_s9 }
  0x35   : > { %p533_p6 = pnand %p531_p1, %p519_p7  ;;  %p539_p9 = scmp.lt.s32.totalorder %s537_s10, %s530_s8 }
  0x37   : > { %p534_p3 = pneg %p533_p6  ;;  %p540_p4 = por %p539_p9, %p538_p5 }
  0x39   : > { %p541_p8 = pnand %p540_p4, %p534_p3 }
  0x3b   : > { %544 = shalt.err (!%p541_p8)
}
  0x3c   : > { %443 = dma.hbm_to_vmem [thread:$0]  (!%p728_p11), %s726_s17, 128, %s160_s22, %s149_s25  }
  0x3d   : > { %p828_p12 = scmp.ne.s32.totalorder %s823_s20, 0 }
  0x3e   : > { %s749_s11 = sand.u32 (!%p828_p12), 1, %s605_s13   ;;  %p829_p1 = scmp.ne.s32.totalorder (!%p828_p12), %s821_s18, 0 }
  0x3f   : > { %168 = sbr.rel (%p828_p12) target bundleno = 585 (0x249), region = 32  ;;  %s403_s21 = sshll.u32 (!%p828_p12), %s749_s11, 3 }
  0x40   : > { %s171_s26 = scalar_lea.sflag (!%p828_p12), [#allocation3], %s749_s11  ;;  %s174_s27 = scalar_lea.vmem (!%p828_p12), [#allocation2], %s403_s21 }
  0x44   : > { %588 = dma.done.wait (%p829_p1), %s171_s26, 128  }
  0x45   : > { %590 = vsyncadd (%p829_p1), %s171_s26, 4294967168  ;;  %p830_p4 = scmp.eq.s32.totalorder %s663_s16, 0 }
  0x47   : > { %592 = dma.done.wait (%p830_p4), [#allocation6], 512   ;;  %p831_p6 = pmov %p830_p4 }
  0x48   : > { %vm202_vm0 = vcmask 261120   ;;  %v201_v0 = vld [vmem:[%s174_s27] sm:$0xff]  ;;  %v619_v8 = vmov 0.0   ;;  %vm620_vm1 = vmmov 0   ;;  %v218_v10 = vld [vmem:[#allocation5 + $0x8] sm:$0xff]  ;;  %v217_v11 = vld [vmem:[#allocation5] sm:$0xff] }
  0x49   : > { %594 = vsyncadd (%p831_p6), [#allocation6], 4294966784  ;;  %v203_v1 = vsel %vm202_vm0, %v201_v0, 0.0  ;;  %v220_v7 = vld [vmem:[#allocation5 + $0x18] sm:$0xff]  ;;  %417 = vmatprep.subr.mxu0 %v619_v8  ;;  %v219_v9 = vld [vmem:[#allocation5 + $0x10] sm:$0xff]  ;;  %425 = vmatprep.mubr.msk.f32.mxu0 %vm620_vm1, %v619_v8  ;;  %s409_s17 = sshll.u32 %s663_s16, 7 }
  0x4a   : > { %204 = vadd.xlane.f32.xlu0 %v203_v1  ;;  %418 = vmatpush3.msra.mxu0 %v220_v7  ;;  %v406_v17 = vld [vmem:[%s815_s2] ss:$0 sm:$0xff]  ;;  %s200_s22 = scalar_lea.vmem [#allocation7], %s403_s21  ;;  %s775_s29 = scalar_lea.hbm %s816_s3, %s409_s17 }
  0x4b   : > { %419 = vmatprep.subr.mxu0 %v619_v8  ;;  %s316_s23 = sshll.u32 %s200_s22, 4  ;;  %s303_s30 = scalar_lea.sflag [#allocation4], %s749_s11  ;;  %s317_s23 = int_to_ptr.vmem [resolvable:$true] %s316_s23 }
  0x4c   : > { %420 = vmatpush3.msra.mxu0 %v219_v9  ;;  %s545_s4 = scalar_lea.vmem %s317_s23, 128  ;;  %p832_p3 = scmp.ne.s32.totalorder %s826_s6, 0 }
  0x4d   : > { %421 = vmatprep.subr.mxu0 %v619_v8  ;;  %p546_p8 = scmp.ne.s32.totalorder %s317_s23, %s545_s4  ;;  %s621_s16 = smov [#allocation7]  }
  0x4e   : > { %422 = vmatpush3.msra.mxu0 %v218_v10  ;;  %s549_s8 = sshll.u32 %s621_s16, 4  ;;  %s550_s8 = int_to_ptr.vmem [resolvable:$false] %s549_s8 }
  0x4f   : > { %423 = vmatprep.subr.mxu0 %v619_v8  ;;  %p547_p11 = pnand %p546_p8, %p832_p3  ;;  %s551_s7 = scalar_lea.vmem %s550_s8, 256 }
  0x50   : > { %424 = vmatpush3.msra.mxu0 %v217_v11  ;;  %p552_p10 = scmp.lt.s32.totalorder %s317_s23, %s550_s8  ;;  %p553_p2 = scmp.lt.s32.totalorder %s551_s7, %s545_s4 }
  0x51   : > { %p548_p7 = pneg %p547_p11 }
  0x52   : > { %p554_p13 = por %p553_p2, %p552_p10 }
  0x54   : > { %p555_p0 = pnand %p554_p13, %p548_p7 }
  0xd3   : > { %v205_v2 = vpop.xlane.xlu0 %204 }
  0xd4   : > { %v207_v3 = vmul.f32 0.03125, %v205_v2 }
  0xd6   : > { %v208_v4 = vsub.f32 %v201_v0, %v207_v3 }
  0xd8   : > { %v209_v5 = vmul.f32 %v208_v4, %v208_v4 }
  0xda   : > { %v210_v6 = vsel %vm202_vm0, %v209_v5, 0.0 }
  0xdb   : > { %211 = vadd.xlane.f32.xlu0 %v210_v6 }
 0x164   : > { %v212_v12 = vpop.xlane.xlu0 %211 }
 0x165   : > { %v213_v13 = vmul.f32 0.03125, %v212_v12 }
 0x167   : > { %v214_v14 = vadd.f32 1e-05, %v213_v13 }
 0x169   : > { %489 = vrsqrt.f32 %v214_v14 }
 0x176   : > { %v490_v15 = vpop.eup %489 }
 0x177   : > { %v216_v16 = vmul.f32 %v490_v15, %v208_v4 }
 0x179   : > { %426 = vmatmul.mubr.msk.f32.vlgmr.msra.gmra.mxu0 %vm202_vm0, %v216_v16 }
 0x239   : > { %v297_v18 = vpop.f32.mrf.mxu0 }
 0x23a   : > { %v298_v19 = vadd.f32 %v406_v17, %v297_v18 }
 0x23b   : > { %v427_v20 = vpop.f32.mrf.mxu0 }
 0x23c   : > { %301 = vst.msk [vmem:[%s200_s22] sm:$0xff] %vm202_vm0, %v298_v19 }
 0x23d   : > { %558 = shalt.err (!%p555_p0)
}
 0x23e   : > { %s559_s9 = scalar_lea.hbm %s775_s29, 128  ;;  %s563_s21 = scalar_lea.hbm %s816_s3, 256 }
 0x23f   : > { %p560_p5 = scmp.ne.s32.totalorder %s775_s29, %s559_s9  ;;  %p564_p1 = scmp.lt.s32.totalorder %s775_s29, %s816_s3 }
 0x240   : > { %p565_p4 = scmp.lt.s32.totalorder %s563_s21, %s559_s9 }
 0x241   : > { %p561_p9 = pnand %p560_p5, %p832_p3 }
 0x242   : > { %p566_p6 = por %p565_p4, %p564_p1 }
 0x243   : > { %p562_p12 = pneg %p561_p9 }
 0x245   : > { %p567_p8 = pnand %p566_p6, %p562_p12 }
 0x247   : > { %570 = shalt.err (!%p567_p8)
}
 0x248   : > { %434 = dma.vmem_to_hbm [thread:$0]  (%p832_p3), %s317_s23, 128, %s775_s29, %s303_s30  }
 0x249 PF: > { %s328_s18 = sand.u32 1, %s601_s12   ;;  %p833_p11 = scmp.ne.s32.totalorder %s822_s19, 0 }
 0x24a   : > { %p834_p7 = scmp.ge.s32.totalorder %s613_s15, 2  ;;  %s329_s20 = scalar_lea.sflag [#allocation4], %s328_s18 }
 0x24c   : > { %p445_p10 = pnand %p834_p7, %p833_p11 }
 0x24e   : > { %p446_p2 = pneg %p445_p10 }
 0x250   : > { %596 = dma.done.wait (%p446_p2), %s329_s20, 128  }
 0x251   : > { %598 = vsyncadd (%p446_p2), %s329_s20, 4294967168  ;;  %p17_p13 = scmp.ge.s32.totalorder %s696_s24, 4   ;;  %s835_s12 = smov %s605_s13 }
 0x252   : > { %s836_s13 = smov %s609_s14  ;;  %s837_s14 = smov %s713_s5 }
 0x253   : > { %s838_s15 = smov %s696_s24  ;;  %19 = sbr.rel (!%p17_p13) target bundleno = 6 (0x6), region = 81 }
 0x258   :  { %334 = vsyncpa [#allocation3], 1 }
 0x259   :  { %336 = vsyncpa [#allocation3 + $0x1], 1 }
 0x25a   :  { %337 = vsyncpa [#allocation6], 1 }
 0x25b   :  { %338 = vsyncpa [#allocation4], 1 }
 0x25c   :  { %340 = vsyncpa [#allocation4 + $0x1], 1 }

</bundles_post_ra>
